<compile_context>
chip_gen: v6e
topology: v6e:2x2x1
jax: 0.10.0
libtpu: 0.0.40
codegen_flags: <defaults>
</compile_context>

<pallas_src>
import math
from functools import partial

import jax
import jax.numpy as jnp
from jax import lax
from jax.experimental import pallas as pl
from jax.experimental.pallas import tpu as pltpu


def _round_up(x, m):
    return ((x + m - 1) // m) * m


# ---------------------------------------------------------------------------
# Kernels
# ---------------------------------------------------------------------------

def _gelu_exact(h):
    # exact erf-based GELU (matches torch.nn.GELU default)
    return 0.5 * h * (1.0 + lax.erf(h * (1.0 / math.sqrt(2.0))))


def _resident_kernel(x_ref, g_ref, b_ref, w1_ref, b1_ref, w2_ref, b2_ref, o_ref, *, eps):
    """Whole MLP for one row tile; W1/W2 are fully VMEM-resident (constant index_map)."""
    x = x_ref[...].astype(jnp.float32)
    mean = jnp.mean(x, axis=-1, keepdims=True)
    cen = x - mean
    var = jnp.mean(cen * cen, axis=-1, keepdims=True)
    xn = cen * lax.rsqrt(var + eps)
    xn = xn * g_ref[...].astype(jnp.float32) + b_ref[...].astype(jnp.float32)

    h = jnp.dot(xn.astype(w1_ref.dtype), w1_ref[...], preferred_element_type=jnp.float32)
    h = _gelu_exact(h + b1_ref[...].astype(jnp.float32))
    # dropout1 / dropout2: identity at inference time.
    y = jnp.dot(h.astype(w2_ref.dtype), w2_ref[...], preferred_element_type=jnp.float32)
    y = y + b2_ref[...].astype(jnp.float32)
    o_ref[...] = (x + y).astype(o_ref.dtype)


def _tiled_kernel(x_ref, g_ref, b_ref, w1_ref, b1_ref, w2_ref, b2_ref,
                  o_ref, xn_ref, acc_ref, *, eps):
    """Hidden dim tiled on a trailing 'arbitrary' axis; f32 accumulator in VMEM."""
    k = pl.program_id(1)

    # ---- k == 0: LayerNorm once per row tile; zero the f32 accumulator ----
    @pl.when(k == 0)
    def _():
        x = x_ref[...].astype(jnp.float32)
        mean = jnp.mean(x, axis=-1, keepdims=True)
        cen = x - mean
        var = jnp.mean(cen * cen, axis=-1, keepdims=True)
        xn = cen * lax.rsqrt(var + eps)
        xn = xn * g_ref[...].astype(jnp.float32) + b_ref[...].astype(jnp.float32)
        xn_ref[...] = xn.astype(xn_ref.dtype)
        acc_ref[...] = jnp.zeros_like(acc_ref)

    # ---- hidden-dim tile: h = GELU(xn @ W1_k + b1_k); acc += h @ W2_k ----
    h = jnp.dot(xn_ref[...], w1_ref[...], preferred_element_type=jnp.float32)
    h = _gelu_exact(h + b1_ref[...].astype(jnp.float32))
    acc_ref[...] += jnp.dot(h.astype(w2_ref.dtype), w2_ref[...],
                            preferred_element_type=jnp.float32)

    # ---- k == last: bias2 + residual, single lane-dense store ----
    @pl.when(k == pl.num_programs(1) - 1)
    def _():
        y = acc_ref[...] + b2_ref[...].astype(jnp.float32)
        o_ref[...] = (x_ref[...].astype(jnp.float32) + y).astype(o_ref.dtype)


# ---------------------------------------------------------------------------
# Hardware-aware tiling selection
# ---------------------------------------------------------------------------

def _vmem_budget_bytes():
    """75% of per-core VMEM capacity (v7x: 64 MiB -> 48 MiB; v5e/v6e: 128 -> 96 MiB)."""
    try:
        cap = int(pltpu.get_tpu_info().vmem_capacity_bytes)
    except Exception:
        cap = 64 * 1024 * 1024          # conservative default (v7x per-TC)
    return max(16 * 1024 * 1024, int(cap * 0.75))


def _pick_row_tile(n8, target):
    tm = min(_round_up(target, 8), n8)
    # Keep >= 2 row tiles when there are enough rows so the "parallel" axis can be
    # sharded across both v7x TensorCores (megacore).
    if n8 >= 16 and (n8 + tm - 1) // tm < 2:
        tm = _round_up((n8 + 1) // 2, 8)
    return tm


def _select_config(N, D, H, x_itemsize, out_itemsize, wt_itemsize, vmem_budget,
                   row_tile, hidden_tile, force_hidden_tiling):
    n8 = _round_up(max(N, 1), 8)

    def resident_bytes(tm):
        return (2 * D * H * wt_itemsize                         # W1 + W2, single-buffered
                + (H + 3 * D) * 4                               # b1 / gamma / beta / b2
                + 2 * tm * D * (x_itemsize + out_itemsize)      # x & o, double-buffered
                + tm * (H + 2 * D) * 4)                         # f32 h / xn / y intermediates

    def tiled_bytes(tm, th):
        return (2 * 2 * D * th * wt_itemsize                    # W1/W2 tiles, double-buffered
                + 2 * th * 4 + 2 * 3 * D * 4                    # b1 tile + LN params + b2
                + 2 * tm * D * (x_itemsize + out_itemsize)      # x & o, double-buffered
                + tm * D * (wt_itemsize + 4)                    # xn cache + f32 accumulator
                + tm * th * 4)                                   # f32 h intermediate

    # ---- strategy 1: fully resident weights (preferred) ----
    if not force_hidden_tiling:
        tm = _pick_row_tile(n8, row_tile if row_tile is not None else 512)
        while tm > 8 and resident_bytes(tm) > vmem_budget:
            tm = max(8, _round_up(tm // 2, 8))
        if resident_bytes(tm) <= vmem_budget:
            return tm, H, True

    # ---- strategy 2: stream weights, tile H; amortise with a big row tile ----
    cap = hidden_tile if hidden_tile is not None else H
    cands = []
    for t in (hidden_tile, 2048, 1024, 512, 256, 128):
        if t and t <= min(H, cap) and H % t == 0 and t % 128 == 0:
            cands.append(int(t))
    # Prefer multiples of 256 (v6e/v7x MXU tile width), then largest.
    cands = sorted(set(cands), key=lambda t: (t % 256 == 0, t), reverse=True)
    if not cands:
        cands = [H]

    tm = _pick_row_tile(n8, row_tile if row_tile is not None else 1024)
    while True:
        for th in cands:
            if tiled_bytes(tm, th) <= vmem_budget:
                return tm, th, False
        if tm <= 8:
            return 8, cands[-1], False
        tm = max(8, _round_up(tm // 2, 8))


# ---------------------------------------------------------------------------
# Wrapper
# ---------------------------------------------------------------------------

def residual_mlp(x, gamma, beta, w1, b1, w2, b2, *, eps=1e-5,
                 row_tile=None, hidden_tile=None, force_hidden_tiling=False):
    """x: (..., D). Weights: w1 (D, H), b1 (H,), w2 (H, D), b2 (D,), H = 4*D.

    Weights are used in the dtype they are passed in -- cast them to bf16 ONCE at init
    time for MXU execution; no per-call cast happens here (avoids extra HBM traffic).
    """
    orig_shape = x.shape
    D = orig_shape[-1]
    H = w1.shape[1]

    xf = x.reshape(-1, D)
    N = xf.shape[0]

    x_itemsize = xf.dtype.itemsize
    out_itemsize = x_itemsize
    wt_dtype = w1.dtype
    wt_itemsize = jnp.dtype(wt_dtype).itemsize

    vmem_budget = _vmem_budget_bytes()
    tm, th, resident = _select_config(N, D, H, x_itemsize, out_itemsize, wt_itemsize,
                                      vmem_budget, row_tile, hidden_tile,
                                      force_hidden_tiling)

    Npad = _round_up(max(N, 1), tm)
    if Npad != N:
        xf = jnp.pad(xf, ((0, Npad - N), (0, 0)))
    n_row_tiles = Npad // tm

    gamma2 = gamma.reshape(1, D).astype(jnp.float32)
    beta2 = beta.reshape(1, D).astype(jnp.float32)
    b1_row = b1.reshape(1, H).astype(jnp.float32)
    b2_row = b2.reshape(1, D).astype(jnp.float32)

    # Advisory cost estimate: in the tiled path the weights are re-streamed per row tile.
    flops = 4 * Npad * D * H
    transcendentals = Npad * H
    weight_bytes = 2 * D * H * wt_itemsize
    small_bytes = (H + 3 * D) * 4
    io_bytes = 2 * Npad * D * x_itemsize
    if resident:
        bytes_accessed = io_bytes + weight_bytes + small_bytes
    else:
        bytes_accessed = io_bytes + n_row_tiles * (weight_bytes + small_bytes)
    cost = pl.CostEstimate(flops=flops, transcendentals=transcendentals,
                           bytes_accessed=bytes_accessed)

    args = (xf, gamma2, beta2, w1, b1_row, w2, b2_row)

    if resident:
        def run(single_buffer):
            const_kw = {"pipeline_mode": pl.Buffered(1)} if single_buffer else {}
            in_specs = [
                pl.BlockSpec((tm, D), lambda i: (i, 0)),              # x rows
                pl.BlockSpec((1, D), lambda i: (0, 0), **const_kw),   # gamma (resident)
                pl.BlockSpec((1, D), lambda i: (0, 0), **const_kw),   # beta  (resident)
                pl.BlockSpec((D, H), lambda i: (0, 0), **const_kw),   # W1    (resident)
                pl.BlockSpec((1, H), lambda i: (0, 0), **const_kw),   # b1    (resident)
                pl.BlockSpec((H, D), lambda i: (0, 0), **const_kw),   # W2    (resident)
                pl.BlockSpec((1, D), lambda i: (0, 0), **const_kw),   # b2    (resident)
            ]
            return pl.pallas_call(
                partial(_resident_kernel, eps=eps),
                out_shape=jax.ShapeDtypeStruct((Npad, D), x.dtype),
                grid_spec=pltpu.PrefetchScalarGridSpec(
                    num_scalar_prefetch=0,
                    grid=(n_row_tiles,),
                    in_specs=in_specs,
                    out_specs=pl.BlockSpec((tm, D), lambda i: (i, 0)),
                ),
                compiler_params=pltpu.CompilerParams(
                    dimension_semantics=("parallel",),
                    vmem_limit_bytes=vmem_budget,
                ),
                cost_estimate=cost,
            )(*args)

        try:
            out = run(single_buffer=True)
        except Exception:
            # pl.Buffered(1) unsupported on this jax version: fall back to default
            # double-buffered specs (weights still DMA'd only once: constant index_map).
            out = run(single_buffer=False)
    else:
        out = pl.pallas_call(
            partial(_tiled_kernel, eps=eps),
            out_shape=jax.ShapeDtypeStruct((Npad, D), x.dtype),
            grid_spec=pltpu.PrefetchScalarGridSpec(
                num_scalar_prefetch=0,
                grid=(n_row_tiles, H // th),
                in_specs=[
                    pl.BlockSpec((tm, D), lambda i, k: (i, 0)),   # x rows
                    pl.BlockSpec((1, D), lambda i, k: (0, 0)),    # gamma
                    pl.BlockSpec((1, D), lambda i, k: (0, 0)),    # beta
                    pl.BlockSpec((D, th), lambda i, k: (0, k)),   # W1 hidden tile
                    pl.BlockSpec((1, th), lambda i, k: (0, k)),   # b1 hidden tile
                    pl.BlockSpec((th, D), lambda i, k: (k, 0)),   # W2 hidden tile
                    pl.BlockSpec((1, D), lambda i, k: (0, 0)),    # b2
                ],
                out_specs=pl.BlockSpec((tm, D), lambda i, k: (i, 0)),
                scratch_shapes=[
                    pltpu.VMEM((tm, D), wt_dtype),     # cached LayerNorm output
                    pltpu.VMEM((tm, D), jnp.float32),  # f32 accumulator for linear2
                ],
            ),
            compiler_params=pltpu.CompilerParams(
                dimension_semantics=("parallel", "arbitrary"),
                vmem_limit_bytes=vmem_budget,
            ),
            cost_estimate=cost,
        )(*args)

    if Npad != N:
        out = out[:N]
    return out.reshape(orig_shape)


# ---------------------------------------------------------------------------
# Params / reference
# ---------------------------------------------------------------------------

def init_params(key, dim):
    """Deterministic init mirroring the PyTorch module's parameter shapes (f32)."""
    hidden = 4 * dim
    k1, k2, k3, k4 = jax.random.split(key, 4)
    lim1 = 1.0 / math.sqrt(dim)
    lim2 = 1.0 / math.sqrt(hidden)
    w1 = jax.random.uniform(k1, (dim, hidden), jnp.float32, -lim1, lim1)
    b1 = jax.random.uniform(k2, (hidden,), jnp.float32, -lim1, lim1)
    w2 = jax.random.uniform(k3, (hidden, dim), jnp.float32, -lim2, lim2)
    b2 = jax.random.uniform(k4, (dim,), jnp.float32, -lim2, lim2)
    gamma = jnp.ones((dim,), jnp.float32)   # nn.LayerNorm default weight
    beta = jnp.zeros((dim,), jnp.float32)   # nn.LayerNorm default bias
    return gamma, beta, w1, b1, w2, b2


def residual_mlp_ref(x, gamma, beta, w1, b1, w2, b2, *, eps=1e-5):
    """Pure-JAX f32 reference for correctness checking."""
    mean = jnp.mean(x, axis=-1, keepdims=True)
    var = jnp.mean((x - mean) ** 2, axis=-1, keepdims=True)
    xn = (x - mean) / jnp.sqrt(var + eps) * gamma + beta
    h = xn @ w1 + b1
    h = 0.5 * h * (1.0 + lax.erf(h / math.sqrt(2.0)))
    y = h @ w2 + b2
    return x + y


if __name__ == "__main__":
    # --- spec-scale shape (B=2, S=8, D=32): correctness smoke test ---
    B, S, D = 2, 8, 32
    key = jax.random.PRNGKey(0)
    kx, kp = jax.random.split(key)
    x = jax.random.normal(kx, (B, S, D), jnp.float32)
    gamma, beta, w1, b1, w2, b2 = init_params(kp, D)
    ref = residual_mlp_ref(x, gamma, beta, w1, b1, w2, b2)

    # f32 weights path (resident-weights strategy): tight structural check.
    out_f32 = jax.block_until_ready(residual_mlp(x, gamma, beta, w1, b1, w2, b2))
    assert out_f32.shape == x.shape and out_f32.dtype == x.dtype
    err = float(jnp.max(jnp.abs(out_f32 - ref)))
    assert err < 1e-4, f"f32 max err {err}"

    # bf16 weights, cast ONCE here (outside the call -- no per-call cast); loose tol.
    w1b, w2b = w1.astype(jnp.bfloat16), w2.astype(jnp.bfloat16)
    out_bf16 = jax.block_until_ready(residual_mlp(x, gamma, beta, w1b, b1, w2b, b2))
    err = float(jnp.max(jnp.abs(out_bf16 - ref)))
    assert err < 5e-2, f"bf16 max err {err}"

    # --- lane-dense shape: N=512 rows, D=128, H=512 ---
    B2, S2, D2 = 2, 256, 128
    kx2, kp2 = jax.random.split(jax.random.PRNGKey(1))
    x2 = jax.random.normal(kx2, (B2, S2, D2), jnp.float32)
    g2, be2, w1_2, b1_2, w2_2, b2_2 = init_params(kp2, D2)
    ref2 = residual_mlp_ref(x2, g2, be2, w1_2, b1_2, w2_2, b2_2)
    w1_2b, w2_2b = w1_2.astype(jnp.bfloat16), w2_2.astype(jnp.bfloat16)

    # (a) resident-weights path, 2 row tiles (megacore-friendly 1-D grid).
    out_res = jax.block_until_ready(
        residual_mlp(x2, g2, be2, w1_2b, b1_2, w2_2b, b2_2, row_tile=256))
    rel = float(jnp.max(jnp.abs(out_res - ref2)) / (jnp.max(jnp.abs(ref2)) + 1e-6))
    assert out_res.shape == x2.shape and rel < 5e-2, f"resident rel err {rel}"

    # (b) hidden-tiled fallback (forced): grid = (2 row tiles, 2 hidden tiles).
    out_tiled = jax.block_until_ready(
        residual_mlp(x2, g2, be2, w1_2b, b1_2, w2_2b, b2_2,
                     row_tile=256, hidden_tile=256, force_hidden_tiling=True))
    rel = float(jnp.max(jnp.abs(out_tiled - ref2)) / (jnp.max(jnp.abs(ref2)) + 1e-6))
    assert out_tiled.shape == x2.shape and rel < 5e-2, f"tiled rel err {rel}"

    print("KERNEL_OK")
</pallas_src>

<mosaic_0001>
module attributes {stable_mosaic.version = 11 : i64} {
  func.func @_resident_kernel(%arg0: i32, %arg1: memref<8x32xf32, #tpu.memory_space<vmem>>, %arg2: memref<1x32xf32, #tpu.memory_space<vmem>>, %arg3: memref<1x32xf32, #tpu.memory_space<vmem>>, %arg4: memref<32x128xf32, #tpu.memory_space<vmem>>, %arg5: memref<1x128xf32, #tpu.memory_space<vmem>>, %arg6: memref<128x32xf32, #tpu.memory_space<vmem>>, %arg7: memref<1x32xf32, #tpu.memory_space<vmem>>, %arg8: memref<8x32xf32, #tpu.memory_space<vmem>>) attributes {dimension_semantics = [#tpu.dimension_semantics<parallel>], iteration_bounds = array<i64: 2>, scalar_prefetch = 0 : i64, scratch_operands = 0 : i64, tpu.core_type = #tpu.core_type<tc>, window_params = [{transform_indices = @transform_0, window_bounds = array<i64: 8, 32>}, {pipeline_mode = #tpu.pipeline_mode<synchronous>, transform_indices = @transform_1, window_bounds = array<i64: 1, 32>}, {pipeline_mode = #tpu.pipeline_mode<synchronous>, transform_indices = @transform_2, window_bounds = array<i64: 1, 32>}, {pipeline_mode = #tpu.pipeline_mode<synchronous>, transform_indices = @transform_3, window_bounds = array<i64: 32, 128>}, {pipeline_mode = #tpu.pipeline_mode<synchronous>, transform_indices = @transform_4, window_bounds = array<i64: 1, 128>}, {pipeline_mode = #tpu.pipeline_mode<synchronous>, transform_indices = @transform_5, window_bounds = array<i64: 128, 32>}, {pipeline_mode = #tpu.pipeline_mode<synchronous>, transform_indices = @transform_6, window_bounds = array<i64: 1, 32>}, {transform_indices = @transform_7, window_bounds = array<i64: 8, 32>}]} {
    %c0 = arith.constant 0 : index
    %c0_0 = arith.constant 0 : index
    %0 = vector.load %arg1[%c0, %c0_0] : memref<8x32xf32, #tpu.memory_space<vmem>>, vector<8x32xf32>
    %cst = arith.constant dense<0.000000e+00> : vector<8xf32>
    %1 = vector.multi_reduction <add>, %0, %cst [1] : vector<8x32xf32> to vector<8xf32>
    %2 = vector.shape_cast %1 : vector<8xf32> to vector<8x1xf32>
    %cst_1 = arith.constant 3.200000e+01 : f32
    %3 = vector.broadcast %cst_1 : f32 to vector<8x1xf32>
    %4 = arith.divf %2, %3 : vector<8x1xf32>
    %5 = vector.broadcast %4 : vector<8x1xf32> to vector<8x32xf32>
    %6 = arith.subf %0, %5 : vector<8x32xf32>
    %7 = arith.mulf %6, %6 : vector<8x32xf32>
    %cst_2 = arith.constant dense<0.000000e+00> : vector<8xf32>
    %8 = vector.multi_reduction <add>, %7, %cst_2 [1] : vector<8x32xf32> to vector<8xf32>
    %9 = vector.shape_cast %8 : vector<8xf32> to vector<8x1xf32>
    %cst_3 = arith.constant 3.200000e+01 : f32
    %10 = vector.broadcast %cst_3 : f32 to vector<8x1xf32>
    %11 = arith.divf %9, %10 : vector<8x1xf32>
    %cst_4 = arith.constant 9.99999974E-6 : f32
    %12 = vector.broadcast %cst_4 : f32 to vector<8x1xf32>
    %13 = arith.addf %11, %12 : vector<8x1xf32>
    %14 = math.rsqrt %13 : vector<8x1xf32>
    %15 = vector.broadcast %14 : vector<8x1xf32> to vector<8x32xf32>
    %16 = arith.mulf %6, %15 : vector<8x32xf32>
    %c0_5 = arith.constant 0 : index
    %c0_6 = arith.constant 0 : index
    %17 = vector.load %arg2[%c0_5, %c0_6] : memref<1x32xf32, #tpu.memory_space<vmem>>, vector<1x32xf32>
    %18 = vector.broadcast %17 : vector<1x32xf32> to vector<8x32xf32>
    %19 = arith.mulf %16, %18 : vector<8x32xf32>
    %c0_7 = arith.constant 0 : index
    %c0_8 = arith.constant 0 : index
    %20 = vector.load %arg3[%c0_7, %c0_8] : memref<1x32xf32, #tpu.memory_space<vmem>>, vector<1x32xf32>
    %21 = vector.broadcast %20 : vector<1x32xf32> to vector<8x32xf32>
    %22 = arith.addf %19, %21 : vector<8x32xf32>
    %c0_9 = arith.constant 0 : index
    %c0_10 = arith.constant 0 : index
    %23 = vector.load %arg4[%c0_9, %c0_10] : memref<32x128xf32, #tpu.memory_space<vmem>>, vector<32x128xf32>
    %cst_11 = arith.constant dense<0.000000e+00> : vector<8x128xf32>
    %24 = tpu.matmul %22, %23, %cst_11 {dimension_numbers = #tpu.dot_dimension_numbers<[1], [0], [0], [1], [0, 0, 1, 1], [], []>} : vector<8x32xf32>, vector<32x128xf32>, vector<8x128xf32> -> vector<8x128xf32>
    %c0_12 = arith.constant 0 : index
    %c0_13 = arith.constant 0 : index
    %25 = vector.load %arg5[%c0_12, %c0_13] : memref<1x128xf32, #tpu.memory_space<vmem>>, vector<1x128xf32>
    %26 = vector.broadcast %25 : vector<1x128xf32> to vector<8x128xf32>
    %27 = arith.addf %24, %26 : vector<8x128xf32>
    %cst_14 = arith.constant 5.000000e-01 : f32
    %28 = vector.broadcast %cst_14 : f32 to vector<8x128xf32>
    %29 = arith.mulf %28, %27 : vector<8x128xf32>
    %cst_15 = arith.constant 0.707106769 : f32
    %30 = vector.broadcast %cst_15 : f32 to vector<8x128xf32>
    %31 = arith.mulf %27, %30 : vector<8x128xf32>
    %32 = math.erf %31 : vector<8x128xf32>
    %cst_16 = arith.constant 1.000000e+00 : f32
    %33 = vector.broadcast %cst_16 : f32 to vector<8x128xf32>
    %34 = arith.addf %33, %32 : vector<8x128xf32>
    %35 = arith.mulf %29, %34 : vector<8x128xf32>
    %c0_17 = arith.constant 0 : index
    %c0_18 = arith.constant 0 : index
    %36 = vector.load %arg6[%c0_17, %c0_18] : memref<128x32xf32, #tpu.memory_space<vmem>>, vector<128x32xf32>
    %cst_19 = arith.constant dense<0.000000e+00> : vector<8x32xf32>
    %37 = tpu.matmul %35, %36, %cst_19 {dimension_numbers = #tpu.dot_dimension_numbers<[1], [0], [0], [1], [0, 0, 1, 1], [], []>} : vector<8x128xf32>, vector<128x32xf32>, vector<8x32xf32> -> vector<8x32xf32>
    %c0_20 = arith.constant 0 : index
    %c0_21 = arith.constant 0 : index
    %38 = vector.load %arg7[%c0_20, %c0_21] : memref<1x32xf32, #tpu.memory_space<vmem>>, vector<1x32xf32>
    %39 = vector.broadcast %38 : vector<1x32xf32> to vector<8x32xf32>
    %40 = arith.addf %37, %39 : vector<8x32xf32>
    %41 = arith.addf %0, %40 : vector<8x32xf32>
    %c0_22 = arith.constant 0 : index
    %c0_23 = arith.constant 0 : index
    %42 = vector.load %arg8[%c0_22, %c0_23] : memref<8x32xf32, #tpu.memory_space<vmem>>, vector<8x32xf32>
    tpu.vector_store %arg8[%c0_22, %c0_23], %41 {strides = array<i32>} : memref<8x32xf32, #tpu.memory_space<vmem>>, vector<8x32xf32>,
    return
  }
  func.func @transform_0(%arg0: i32) -> (i32, i32) {
    %c0_i32 = arith.constant 0 : i32
    %c0_i32_0 = arith.constant 0 : i32
    return %arg0, %c0_i32 : i32, i32
  }
  func.func @transform_1(%arg0: i32) -> (i32, i32) {
    %c0_i32 = arith.constant 0 : i32
    %c0_i32_0 = arith.constant 0 : i32
    %c0_i32_1 = arith.constant 0 : i32
    return %c0_i32, %c0_i32_0 : i32, i32
  }
  func.func @transform_2(%arg0: i32) -> (i32, i32) {
    %c0_i32 = arith.constant 0 : i32
    %c0_i32_0 = arith.constant 0 : i32
    %c0_i32_1 = arith.constant 0 : i32
    return %c0_i32, %c0_i32_0 : i32, i32
  }
  func.func @transform_3(%arg0: i32) -> (i32, i32) {
    %c0_i32 = arith.constant 0 : i32
    %c0_i32_0 = arith.constant 0 : i32
    %c0_i32_1 = arith.constant 0 : i32
    return %c0_i32, %c0_i32_0 : i32, i32
  }
  func.func @transform_4(%arg0: i32) -> (i32, i32) {
    %c0_i32 = arith.constant 0 : i32
    %c0_i32_0 = arith.constant 0 : i32
    %c0_i32_1 = arith.constant 0 : i32
    return %c0_i32, %c0_i32_0 : i32, i32
  }
  func.func @transform_5(%arg0: i32) -> (i32, i32) {
    %c0_i32 = arith.constant 0 : i32
    %c0_i32_0 = arith.constant 0 : i32
    %c0_i32_1 = arith.constant 0 : i32
    return %c0_i32, %c0_i32_0 : i32, i32
  }
  func.func @transform_6(%arg0: i32) -> (i32, i32) {
    %c0_i32 = arith.constant 0 : i32
    %c0_i32_0 = arith.constant 0 : i32
    %c0_i32_1 = arith.constant 0 : i32
    return %c0_i32, %c0_i32_0 : i32, i32
  }
  func.func @transform_7(%arg0: i32) -> (i32, i32) {
    %c0_i32 = arith.constant 0 : i32
    %c0_i32_0 = arith.constant 0 : i32
    return %arg0, %c0_i32 : i32, i32
  }
}

module attributes {stable_mosaic.version = 11 : i64} {
  func.func @_resident_kernel(%arg0: i32, %arg1: memref<8x32xf32, #tpu.memory_space<vmem>>, %arg2: memref<1x32xf32, #tpu.memory_space<vmem>>, %arg3: memref<1x32xf32, #tpu.memory_space<vmem>>, %arg4: memref<32x128xf32, #tpu.memory_space<vmem>>, %arg5: memref<1x128xf32, #tpu.memory_space<vmem>>, %arg6: memref<128x32xf32, #tpu.memory_space<vmem>>, %arg7: memref<1x32xf32, #tpu.memory_space<vmem>>, %arg8: memref<8x32xf32, #tpu.memory_space<vmem>>) attributes {dimension_semantics = [#tpu.dimension_semantics<parallel>], iteration_bounds = array<i64: 2>, scalar_prefetch = 0 : i64, scratch_operands = 0 : i64, tpu.core_type = #tpu.core_type<tc>, window_params = [{transform_indices = @transform_0, window_bounds = array<i64: 8, 32>}, {pipeline_mode = #tpu.pipeline_mode<synchronous>, transform_indices = @transform_1, window_bounds = array<i64: 1, 32>}, {pipeline_mode = #tpu.pipeline_mode<synchronous>, transform_indices = @transform_2, window_bounds = array<i64: 1, 32>}, {pipeline_mode = #tpu.pipeline_mode<synchronous>, transform_indices = @transform_3, window_bounds = array<i64: 32, 128>}, {pipeline_mode = #tpu.pipeline_mode<synchronous>, transform_indices = @transform_4, window_bounds = array<i64: 1, 128>}, {pipeline_mode = #tpu.pipeline_mode<synchronous>, transform_indices = @transform_5, window_bounds = array<i64: 128, 32>}, {pipeline_mode = #tpu.pipeline_mode<synchronous>, transform_indices = @transform_6, window_bounds = array<i64: 1, 32>}, {transform_indices = @transform_7, window_bounds = array<i64: 8, 32>}]} {
    %c0 = arith.constant 0 : index
    %c0_0 = arith.constant 0 : index
    %0 = vector.load %arg1[%c0, %c0_0] : memref<8x32xf32, #tpu.memory_space<vmem>>, vector<8x32xf32>
    %cst = arith.constant dense<0.000000e+00> : vector<8xf32>
    %1 = vector.multi_reduction <add>, %0, %cst [1] : vector<8x32xf32> to vector<8xf32>
    %2 = vector.shape_cast %1 : vector<8xf32> to vector<8x1xf32>
    %cst_1 = arith.constant 3.200000e+01 : f32
    %3 = vector.broadcast %cst_1 : f32 to vector<8x1xf32>
    %4 = arith.divf %2, %3 : vector<8x1xf32>
    %5 = vector.broadcast %4 : vector<8x1xf32> to vector<8x32xf32>
    %6 = arith.subf %0, %5 : vector<8x32xf32>
    %7 = arith.mulf %6, %6 : vector<8x32xf32>
    %cst_2 = arith.constant dense<0.000000e+00> : vector<8xf32>
    %8 = vector.multi_reduction <add>, %7, %cst_2 [1] : vector<8x32xf32> to vector<8xf32>
    %9 = vector.shape_cast %8 : vector<8xf32> to vector<8x1xf32>
    %cst_3 = arith.constant 3.200000e+01 : f32
    %10 = vector.broadcast %cst_3 : f32 to vector<8x1xf32>
    %11 = arith.divf %9, %10 : vector<8x1xf32>
    %cst_4 = arith.constant 9.99999974E-6 : f32
    %12 = vector.broadcast %cst_4 : f32 to vector<8x1xf32>
    %13 = arith.addf %11, %12 : vector<8x1xf32>
    %14 = math.rsqrt %13 : vector<8x1xf32>
    %15 = vector.broadcast %14 : vector<8x1xf32> to vector<8x32xf32>
    %16 = arith.mulf %6, %15 : vector<8x32xf32>
    %c0_5 = arith.constant 0 : index
    %c0_6 = arith.constant 0 : index
    %17 = vector.load %arg2[%c0_5, %c0_6] : memref<1x32xf32, #tpu.memory_space<vmem>>, vector<1x32xf32>
    %18 = vector.broadcast %17 : vector<1x32xf32> to vector<8x32xf32>
    %19 = arith.mulf %16, %18 : vector<8x32xf32>
    %c0_7 = arith.constant 0 : index
    %c0_8 = arith.constant 0 : index
    %20 = vector.load %arg3[%c0_7, %c0_8] : memref<1x32xf32, #tpu.memory_space<vmem>>, vector<1x32xf32>
    %21 = vector.broadcast %20 : vector<1x32xf32> to vector<8x32xf32>
    %22 = arith.addf %19, %21 : vector<8x32xf32>
    %c0_9 = arith.constant 0 : index
    %c0_10 = arith.constant 0 : index
    %23 = vector.load %arg4[%c0_9, %c0_10] : memref<32x128xf32, #tpu.memory_space<vmem>>, vector<32x128xf32>
    %cst_11 = arith.constant dense<0.000000e+00> : vector<8x128xf32>
    %24 = tpu.matmul %22, %23, %cst_11 {dimension_numbers = #tpu.dot_dimension_numbers<[1], [0], [0], [1], [0, 0, 1, 1], [], []>} : vector<8x32xf32>, vector<32x128xf32>, vector<8x128xf32> -> vector<8x128xf32>
    %c0_12 = arith.constant 0 : index
    %c0_13 = arith.constant 0 : index
    %25 = vector.load %arg5[%c0_12, %c0_13] : memref<1x128xf32, #tpu.memory_space<vmem>>, vector<1x128xf32>
    %26 = vector.broadcast %25 : vector<1x128xf32> to vector<8x128xf32>
    %27 = arith.addf %24, %26 : vector<8x128xf32>
    %cst_14 = arith.constant 5.000000e-01 : f32
    %28 = vector.broadcast %cst_14 : f32 to vector<8x128xf32>
    %29 = arith.mulf %28, %27 : vector<8x128xf32>
    %cst_15 = arith.constant 0.707106769 : f32
    %30 = vector.broadcast %cst_15 : f32 to vector<8x128xf32>
    %31 = arith.mulf %27, %30 : vector<8x128xf32>
    %32 = math.erf %31 : vector<8x128xf32>
    %cst_16 = arith.constant 1.000000e+00 : f32
    %33 = vector.broadcast %cst_16 : f32 to vector<8x128xf32>
    %34 = arith.addf %33, %32 : vector<8x128xf32>
    %35 = arith.mulf %29, %34 : vector<8x128xf32>
    %c0_17 = arith.constant 0 : index
    %c0_18 = arith.constant 0 : index
    %36 = vector.load %arg6[%c0_17, %c0_18] : memref<128x32xf32, #tpu.memory_space<vmem>>, vector<128x32xf32>
    %cst_19 = arith.constant dense<0.000000e+00> : vector<8x32xf32>
    %37 = tpu.matmul %35, %36, %cst_19 {dimension_numbers = #tpu.dot_dimension_numbers<[1], [0], [0], [1], [0, 0, 1, 1], [], []>} : vector<8x128xf32>, vector<128x32xf32>, vector<8x32xf32> -> vector<8x32xf32>
    %c0_20 = arith.constant 0 : index
    %c0_21 = arith.constant 0 : index
    %38 = vector.load %arg7[%c0_20, %c0_21] : memref<1x32xf32, #tpu.memory_space<vmem>>, vector<1x32xf32>
    %39 = vector.broadcast %38 : vector<1x32xf32> to vector<8x32xf32>
    %40 = arith.addf %37, %39 : vector<8x32xf32>
    %41 = arith.addf %0, %40 : vector<8x32xf32>
    %c0_22 = arith.constant 0 : index
    %c0_23 = arith.constant 0 : index
    %42 = vector.load %arg8[%c0_22, %c0_23] : memref<8x32xf32, #tpu.memory_space<vmem>>, vector<8x32xf32>
    tpu.vector_store %arg8[%c0_22, %c0_23], %41 {strides = array<i32>} : memref<8x32xf32, #tpu.memory_space<vmem>>, vector<8x32xf32>,
    return
  }
  func.func @transform_0(%arg0: i32) -> (i32, i32) {
    %c0_i32 = arith.constant 0 : i32
    %c0_i32_0 = arith.constant 0 : i32
    return %arg0, %c0_i32 : i32, i32
  }
  func.func @transform_1(%arg0: i32) -> (i32, i32) {
    %c0_i32 = arith.constant 0 : i32
    %c0_i32_0 = arith.constant 0 : i32
    %c0_i32_1 = arith.constant 0 : i32
    return %c0_i32, %c0_i32_0 : i32, i32
  }
  func.func @transform_2(%arg0: i32) -> (i32, i32) {
    %c0_i32 = arith.constant 0 : i32
    %c0_i32_0 = arith.constant 0 : i32
    %c0_i32_1 = arith.constant 0 : i32
    return %c0_i32, %c0_i32_0 : i32, i32
  }
  func.func @transform_3(%arg0: i32) -> (i32, i32) {
    %c0_i32 = arith.constant 0 : i32
    %c0_i32_0 = arith.constant 0 : i32
    %c0_i32_1 = arith.constant 0 : i32
    return %c0_i32, %c0_i32_0 : i32, i32
  }
  func.func @transform_4(%arg0: i32) -> (i32, i32) {
    %c0_i32 = arith.constant 0 : i32
    %c0_i32_0 = arith.constant 0 : i32
    %c0_i32_1 = arith.constant 0 : i32
    return %c0_i32, %c0_i32_0 : i32, i32
  }
  func.func @transform_5(%arg0: i32) -> (i32, i32) {
    %c0_i32 = arith.constant 0 : i32
    %c0_i32_0 = arith.constant 0 : i32
    %c0_i32_1 = arith.constant 0 : i32
    return %c0_i32, %c0_i32_0 : i32, i32
  }
  func.func @transform_6(%arg0: i32) -> (i32, i32) {
    %c0_i32 = arith.constant 0 : i32
    %c0_i32_0 = arith.constant 0 : i32
    %c0_i32_1 = arith.constant 0 : i32
    return %c0_i32, %c0_i32_0 : i32, i32
  }
  func.func @transform_7(%arg0: i32) -> (i32, i32) {
    %c0_i32 = arith.constant 0 : i32
    %c0_i32_0 = arith.constant 0 : i32
    return %arg0, %c0_i32 : i32, i32
  }
}

</mosaic_0001>

<bundles_post_ra>
// kernel: tpu_custom_call.1
= control target key start
LH: loop header
LB: loop body
LE: loop exit
PB: predicated region body
PF: predicated region fallthrough
CT: control target
= control target key end

     0   :  { %12 = vsyncpa [#allocation3], 0  ;;  %s986_s0 = inlined_call_operand.vmem [shape: f32[16,32], index: 0, kind: input, shape index: {}]   ;;  %s987_s1 = inlined_call_operand.vmem [shape: f32[1,32], index: 1, kind: input, shape index: {}]   ;;  %s988_s2 = inlined_call_operand.vmem [shape: f32[1,32], index: 2, kind: input, shape index: {}]   ;;  %s989_s3 = inlined_call_operand.vmem [shape: f32[32,128], index: 3, kind: input, shape index: {}]   ;;  %s990_s4 = inlined_call_operand.vmem [shape: f32[1,128], index: 4, kind: input, shape index: {}]   ;;  %s991_s5 = inlined_call_operand.vmem [shape: f32[128,32], index: 5, kind: input, shape index: {}]   ;;  %s992_s6 = inlined_call_operand.vmem [shape: f32[1,32], index: 6, kind: input, shape index: {}]   ;;  %s993_s7 = inlined_call_operand.hbm [shape: f32[16,32], index: 7, kind: output, shape index: {}]  }
   0x1   :  { %14 = vsyncpa [#allocation3 + $0x1], 0  ;;  %s796_s24 = smov 0   ;;  %s798_s25 = smov 0  }
   0x2   :  { %s800_s26 = smov 0   ;;  %s802_s27 = smov 0  }
   0x3 LB: > { %s817_s28 = sadd.s32 4294967295, %s751_s27   ;;  %s563_s29 = sadd.s32 4294967294, %s751_s27   ;;  %s751_s27 = sphi %s802_s27, %s999_s27   ;;  %s747_s26 = sphi %s800_s26, %s998_s26   ;;  %s743_s25 = sphi %s798_s25, %s997_s25   ;;  %s739_s24 = sphi %s796_s24, %s996_s24  }
   0x4   : > { %s821_s30 = sadd.s32 1, %s751_s27   ;;  %s179_s8 = sadd.s32 1, %s747_s26 }
   0x5   : > { %s176_s9 = ssub.s32 %s751_s27, %s821_s30  ;;  %p189_p0 = scmp.ne.s32.totalorder %s747_s26, %s743_s25 }
   0x6   : > { %p177_p1 = scmp.eq.s32.totalorder %s176_s9, 0  ;;  %p190_p2 = scmp.eq.s32.totalorder %s817_s28, 1 }
   0x7   : > { %p195_p3 = scmp.ne.s32.totalorder %s743_s25, %s739_s24  ;;  %p196_p4 = scmp.eq.s32.totalorder %s563_s29, 1 }
   0x8   : > { %s832_s10 = scalar_select %p177_p1, %s747_s26, %s179_s8  }
   0x9   : > { %p834_p5 = por %p190_p2, %p189_p0  ;;  %p838_p6 = por %p196_p4, %p195_p3 }
   0xa   : > { %p566_p7 = scmp.ge.s32.totalorder %s751_s27, 1  ;;  %p239_p8 = scmp.lt.s32.totalorder %s751_s27, 3 }
   0xc   : > { %p240_p9 = pnand %p566_p7, %p239_p8 }
   0xd   : > { %p270_p10 = scmp.lt.s32.totalorder (!%p240_p9), %s817_s28, 1  ;;  %s267_s22 = sand.u32 (!%p240_p9), 1, %s743_s25  }
   0xe   : > { %243 = sbr.rel (%p240_p9) target bundleno = 757 (0x2f5), region = 48  ;;  %s567_s23 = sshll.u32 (!%p240_p9), %s267_s22, 3 }
   0xf   : > { %s575_s9 = sshll.u32 (!%p240_p9), %s817_s28, 7  ;;  %s491_s18 = scalar_lea.sflag (!%p240_p9), [#allocation3], %s267_s22 }
  0x13   : > { %s271_s13 = scalar_select %p270_p10, %s817_s28, 1  ;;  %vm275_vm0 = vcmask 261120   ;;  %v309_v7 = vld [vmem:[%s989_s3 + $0x18] sm:$0xff]  ;;  %v753_v8 = vmov 0.0   ;;  %v308_v9 = vld [vmem:[%s989_s3 + $0x10] sm:$0xff]  ;;  %vm754_vm1 = vmmov 0  }
  0x14   : > { %600 = vmatprep.subr.mxu0 %v753_v8  ;;  %608 = vmatprep.mubr.msk.f32.mxu0 %vm754_vm1, %v753_v8  ;;  %v307_v10 = vld [vmem:[%s989_s3 + $0x8] sm:$0xff]  ;;  %v306_v11 = vld [vmem:[%s989_s3] sm:$0xff]  ;;  %v410_v12 = vld [vmem:[%s991_s5 + $0x78] sm:$0xff]  ;;  %s755_s28 = smov [#allocation2]  }
  0x15   : > { %s568_s14 = sshll.u32 %s271_s13, 3  ;;  %601 = vmatpush3.msra.mxu0 %v309_v7  ;;  %611 = vmatprep.subr.mxu1 %v753_v8  ;;  %v409_v13 = vld [vmem:[%s991_s5 + $0x70] sm:$0xff]  ;;  %v408_v14 = vld [vmem:[%s991_s5 + $0x68] sm:$0xff]  ;;  %v407_v15 = vld [vmem:[%s991_s5 + $0x60] sm:$0xff]  ;;  %s269_s13 = scalar_lea.vmem [#allocation2], %s567_s23 }
  0x16   : > { %s273_s17 = scalar_lea.vmem %s986_s0, %s568_s14  ;;  %602 = vmatprep.subr.mxu0 %v753_v8  ;;  %643 = vmatprep.mubr.msk.f32.mxu1 %vm754_vm1, %v753_v8  ;;  %v569_v20 = vld [vmem:[%s987_s1] ss:$0 sm:$0xff]  ;;  %v406_v25 = vld [vmem:[%s991_s5 + $0x58] sm:$0xff]  ;;  %v405_v26 = vld [vmem:[%s991_s5 + $0x50] sm:$0xff]  ;;  %s504_s14 = sshll.u32 %s269_s13, 4  ;;  %s505_s14 = int_to_ptr.vmem [resolvable:$true] %s504_s14 }
  0x17   : > { %v849_v0 = vld [vmem:[%s273_s17] sm:$0xff]  ;;  %603 = vmatpush3.msra.mxu0 %v308_v9  ;;  %612 = vmatpush3.msra.mxu1 %v410_v12  ;;  %v404_v27 = vld [vmem:[%s991_s5 + $0x48] sm:$0xff]  ;;  %v402_v29 = vld [vmem:[%s991_s5 + $0x38] sm:$0xff]  ;;  %s502_s17 = scalar_lea.hbm %s993_s7, %s575_s9  ;;  %s691_s19 = scalar_lea.vmem %s505_s14, 128 }
  0x18   : > { %v276_v1 = vsel %vm275_vm0, %v849_v0, 0.0  ;;  %604 = vmatprep.subr.mxu0 %v753_v8  ;;  %613 = vmatprep.subr.mxu1 %v753_v8  ;;  %v570_v22 = vld [vmem:[%s988_s2] ss:$0 sm:$0xff]  ;;  %v401_v30 = vld [vmem:[%s991_s5 + $0x30] sm:$0xff]  ;;  %v400_v31 = vld [vmem:[%s991_s5 + $0x28] sm:$0xff]  ;;  %p692_p11 = scmp.ne.s32.totalorder %s505_s14, %s691_s19  ;;  %s695_s20 = sshll.u32 %s755_s28, 4  ;;  %s696_s20 = int_to_ptr.vmem [resolvable:$false] %s695_s20 }
  0x19   : > { %277 = vadd.xlane.f32.xlu0 %v276_v1  ;;  %605 = vmatpush3.msra.mxu0 %v307_v10  ;;  %v403_v28 = vld [vmem:[%s991_s5 + $0x40] sm:$0xff]  ;;  %v398_v33 = vld [vmem:[%s991_s5 + $0x18] sm:$0xff]  ;;  %v397_v34 = vld [vmem:[%s991_s5 + $0x10] sm:$0xff]  ;;  %s697_s21 = scalar_lea.vmem %s696_s20, 256  ;;  %p698_p0 = scmp.lt.s32.totalorder %s505_s14, %s696_s20 }
  0x1a   : > { %606 = vmatprep.subr.mxu0 %v753_v8  ;;  %614 = vmatpush3.msra.mxu1 %v409_v13  ;;  %v399_v32 = vld [vmem:[%s991_s5 + $0x20] sm:$0xff]  ;;  %v396_v35 = vld [vmem:[%s991_s5 + $0x8] sm:$0xff]  ;;  %p693_p12 = pnand %p692_p11, %p834_p5  ;;  %p699_p1 = scmp.lt.s32.totalorder %s697_s21, %s691_s19 }
  0x1b   : > { %607 = vmatpush3.msra.mxu0 %v306_v11  ;;  %615 = vmatprep.subr.mxu1 %v753_v8  ;;  %v395_v36 = vld [vmem:[%s991_s5] sm:$0xff] }
  0x1c   : > { %616 = vmatpush3.msra.mxu1 %v408_v14  ;;  %v571_v37 = vld [vmem:[%s990_s4] ss:$0 sm:$0xff]  ;;  %p694_p13 = pneg %p693_p12  ;;  %p700_p2 = por %p699_p1, %p698_p0 }
  0x1d   : > { %617 = vmatprep.subr.mxu1 %v753_v8  ;;  %v573_v46 = vld [vmem:[%s992_s6] ss:$0 sm:$0xff] }
  0x1e   : > { %618 = vmatpush3.msra.mxu1 %v407_v15  ;;  %p701_p3 = pnand %p700_p2, %p694_p13 }
  0x1f   : > { %619 = vmatprep.subr.mxu1 %v753_v8 }
  0x20   : > { %620 = vmatpush3.msra.mxu1 %v406_v25 }
  0x21   : > { %621 = vmatprep.subr.mxu1 %v753_v8 }
  0x22   : > { %622 = vmatpush3.msra.mxu1 %v405_v26 }
  0x23   : > { %623 = vmatprep.subr.mxu1 %v753_v8 }
  0x24   : > { %624 = vmatpush3.msra.mxu1 %v404_v27 }
  0x25   : > { %625 = vmatprep.subr.mxu1 %v753_v8 }
  0x26   : > { %626 = vmatpush3.msra.mxu1 %v403_v28 }
  0x27   : > { %627 = vmatprep.subr.mxu1 %v753_v8 }
  0x28   : > { %628 = vmatpush3.msra.mxu1 %v402_v29 }
  0x29   : > { %629 = vmatprep.subr.mxu1 %v753_v8 }
  0x2a   : > { %630 = vmatpush3.msra.mxu1 %v401_v30 }
  0x2b   : > { %631 = vmatprep.subr.mxu1 %v753_v8 }
  0x2c   : > { %632 = vmatpush3.msra.mxu1 %v400_v31 }
  0x2d   : > { %633 = vmatprep.subr.mxu1 %v753_v8 }
  0x2e   : > { %634 = vmatpush3.msra.mxu1 %v399_v32 }
  0x2f   : > { %635 = vmatprep.subr.mxu1 %v753_v8 }
  0x30   : > { %636 = vmatpush3.msra.mxu1 %v398_v33 }
  0x31   : > { %637 = vmatprep.subr.mxu1 %v753_v8 }
  0x32   : > { %638 = vmatpush3.msra.mxu1 %v397_v34 }
  0x33   : > { %639 = vmatprep.subr.mxu1 %v753_v8 }
  0x34   : > { %640 = vmatpush3.msra.mxu1 %v396_v35 }
  0x35   : > { %641 = vmatprep.subr.mxu1 %v753_v8 }
  0x36   : > { %642 = vmatpush3.msra.mxu1 %v395_v36 }
  0xa2   : > { %v278_v2 = vpop.xlane.xlu0 %277 }
  0xa3   : > { %v280_v3 = vmul.f32 0.03125, %v278_v2 }
  0xa5   : > { %v281_v4 = vsub.f32 %v849_v0, %v280_v3 }
  0xa7   : > { %v282_v5 = vmul.f32 %v281_v4, %v281_v4 }
  0xa9   : > { %v283_v6 = vsel %vm275_vm0, %v282_v5, 0.0 }
  0xaa   : > { %284 = vadd.xlane.f32.xlu0 %v283_v6 }
 0x133   : > { %v285_v16 = vpop.xlane.xlu0 %284 }
 0x134   : > { %v286_v17 = vmul.f32 0.03125, %v285_v16 }
 0x136   : > { %v287_v18 = vadd.f32 1e-05, %v286_v17 }
 0x138   : > { %687 = vrsqrt.f32 %v287_v18 }
 0x145   : > { %v688_v19 = vpop.eup %687 }
 0x146   : > { %v289_v21 = vmul.f32 %v688_v19, %v281_v4 }
 0x148   : > { %v297_v23 = vmul.f32 %v569_v20, %v289_v21 }
 0x14a   : > { %v305_v24 = vadd.f32 %v570_v22, %v297_v23 }
 0x14c   : > { %609 = vmatmul.mubr.msk.f32.vlgmr.msra.gmra.mxu0 %vm275_vm0, %v305_v24 }
 0x20c   : > { %v386_v38 = vpop.f32.mrf.mxu0 }
 0x20d   : > { %v387_v39 = vadd.f32 %v571_v37, %v386_v38 }
 0x20e   : > { %v610_v40 = vpop.f32.mrf.mxu0 }
 0x20f   : > { %v391_v41 = vmul.f32 0.70710677, %v387_v39  ;;  %v390_v43 = vmul.f32 0.5, %v387_v39 }
 0x211   : > { %689 = verf.f32 %v391_v41 }
 0x21e   : > { %v690_v42 = vpop.eup %689 }
 0x21f   : > { %v393_v44 = vadd.f32 1.0, %v690_v42 }
 0x221   : > { %v394_v45 = vmul.f32 %v393_v44, %v390_v43 }
 0x223   : > { %644 = vmatmul.mubr.f32.vlgmr.msra.gmra.mxu1 %v394_v45 }
 0x2e3   : > { %v484_v47 = vpop.f32.mrf.mxu1 }
 0x2e4   : > { %v485_v48 = vadd.f32 %v573_v46, %v484_v47 }
 0x2e5   : > { %v645_v49 = vpop.f32.mrf.mxu1 }
 0x2e6   : > { %v488_v50 = vadd.f32 %v485_v48, %v849_v0 }
 0x2e8   : > { %489 = vst.msk [vmem:[%s269_s13] sm:$0xff] %vm275_vm0, %v488_v50 }
 0x2e9   : > { %704 = shalt.err (!%p701_p3)
}
 0x2ea   : > { %s705_s23 = scalar_lea.hbm %s502_s17, 128  ;;  %s709_s8 = scalar_lea.hbm %s993_s7, 256 }
 0x2eb   : > { %p706_p4 = scmp.ne.s32.totalorder %s502_s17, %s705_s23  ;;  %p710_p9 = scmp.lt.s32.totalorder %s502_s17, %s993_s7 }
 0x2ec   : > { %p711_p10 = scmp.lt.s32.totalorder %s709_s8, %s705_s23 }
 0x2ed   : > { %p707_p7 = pnand %p706_p4, %p834_p5 }
 0x2ee   : > { %p712_p11 = por %p711_p10, %p710_p9 }
 0x2ef   : > { %p708_p8 = pneg %p707_p7 }
 0x2f1   : > { %p713_p12 = pnand %p712_p11, %p708_p8 }
 0x2f3   : > { %716 = shalt.err (!%p713_p12)
}
 0x2f4   : > { %646 = dma.vmem_to_hbm [thread:$0]  (%p834_p5), %s505_s14, 128, %s502_s17, %s491_s18  }
 0x2f5 PF: > { %p652_p13 = scmp.ge.s32.totalorder %s751_s27, 2  ;;  %s516_s15 = sand.u32 1, %s739_s24  }
 0x2f6   : > { %s517_s16 = scalar_lea.sflag [#allocation3], %s516_s15 }
 0x2f7   : > { %p649_p0 = pnand %p652_p13, %p838_p6 }
 0x2f9   : > { %p650_p1 = pneg %p649_p0 }
 0x2fb   : > { %734 = dma.done.wait (%p650_p1), %s517_s16, 128  }
 0x2fc   : > { %736 = vsyncadd (%p650_p1), %s517_s16, 4294967168  ;;  %p17_p2 = scmp.ge.s32.totalorder %s821_s30, 4   ;;  %s996_s24 = smov %s743_s25 }
 0x2fd   : > { %s997_s25 = smov %s747_s26  ;;  %s998_s26 = smov %s832_s10 }
 0x2fe   : > { %s999_s27 = smov %s821_s30  ;;  %19 = sbr.rel (!%p17_p2) target bundleno = 3 (0x3), region = 83 }
 0x303   :  { %522 = vsyncpa [#allocation3], 1 }
 0x304   :  { %524 = vsyncpa [#allocation3 + $0x1], 1 }

// kernel: tpu_custom_call.1
= control target key start
LH: loop header
LB: loop body
LE: loop exit
PB: predicated region body
PF: predicated region fallthrough
CT: control target
= control target key end

     0   :  { %12 = vsyncpa [#allocation3], 0  ;;  %s986_s0 = inlined_call_operand.vmem [shape: f32[16,32], index: 0, kind: input, shape index: {}]   ;;  %s987_s1 = inlined_call_operand.vmem [shape: f32[1,32], index: 1, kind: input, shape index: {}]   ;;  %s988_s2 = inlined_call_operand.vmem [shape: f32[1,32], index: 2, kind: input, shape index: {}]   ;;  %s989_s3 = inlined_call_operand.vmem [shape: f32[32,128], index: 3, kind: input, shape index: {}]   ;;  %s990_s4 = inlined_call_operand.vmem [shape: f32[1,128], index: 4, kind: input, shape index: {}]   ;;  %s991_s5 = inlined_call_operand.vmem [shape: f32[128,32], index: 5, kind: input, shape index: {}]   ;;  %s992_s6 = inlined_call_operand.vmem [shape: f32[1,32], index: 6, kind: input, shape index: {}]   ;;  %s993_s7 = inlined_call_operand.hbm [shape: f32[16,32], index: 7, kind: output, shape index: {}]  }
   0x1   :  { %14 = vsyncpa [#allocation3 + $0x1], 0  ;;  %s796_s24 = smov 0   ;;  %s798_s25 = smov 0  }
   0x2   :  { %s800_s26 = smov 0   ;;  %s802_s27 = smov 0  }
   0x3 LB: > { %s817_s28 = sadd.s32 4294967295, %s751_s27   ;;  %s563_s29 = sadd.s32 4294967294, %s751_s27   ;;  %s751_s27 = sphi %s802_s27, %s999_s27   ;;  %s747_s26 = sphi %s800_s26, %s998_s26   ;;  %s743_s25 = sphi %s798_s25, %s997_s25   ;;  %s739_s24 = sphi %s796_s24, %s996_s24  }
   0x4   : > { %s821_s30 = sadd.s32 1, %s751_s27   ;;  %s179_s8 = sadd.s32 1, %s747_s26 }
   0x5   : > { %s176_s9 = ssub.s32 %s751_s27, %s821_s30  ;;  %p189_p0 = scmp.ne.s32.totalorder %s747_s26, %s743_s25 }
   0x6   : > { %p177_p1 = scmp.eq.s32.totalorder %s176_s9, 0  ;;  %p190_p2 = scmp.eq.s32.totalorder %s817_s28, 1 }
   0x7   : > { %p195_p3 = scmp.ne.s32.totalorder %s743_s25, %s739_s24  ;;  %p196_p4 = scmp.eq.s32.totalorder %s563_s29, 1 }
   0x8   : > { %s832_s10 = scalar_select %p177_p1, %s747_s26, %s179_s8  }
   0x9   : > { %p834_p5 = por %p190_p2, %p189_p0  ;;  %p838_p6 = por %p196_p4, %p195_p3 }
   0xa   : > { %p566_p7 = scmp.ge.s32.totalorder %s751_s27, 1  ;;  %p239_p8 = scmp.lt.s32.totalorder %s751_s27, 3 }
   0xc   : > { %p240_p9 = pnand %p566_p7, %p239_p8 }
   0xd   : > { %p270_p10 = scmp.lt.s32.totalorder (!%p240_p9), %s817_s28, 1  ;;  %s267_s22 = sand.u32 (!%p240_p9), 1, %s743_s25  }
   0xe   : > { %243 = sbr.rel (%p240_p9) target bundleno = 757 (0x2f5), region = 48  ;;  %s567_s23 = sshll.u32 (!%p240_p9), %s267_s22, 3 }
   0xf   : > { %s575_s9 = sshll.u32 (!%p240_p9), %s817_s28, 7  ;;  %s491_s18 = scalar_lea.sflag (!%p240_p9), [#allocation3], %s267_s22 }
  0x13   : > { %s271_s13 = scalar_select %p270_p10, %s817_s28, 1  ;;  %vm275_vm0 = vcmask 261120   ;;  %v309_v7 = vld [vmem:[%s989_s3 + $0x18] sm:$0xff]  ;;  %v753_v8 = vmov 0.0   ;;  %v308_v9 = vld [vmem:[%s989_s3 + $0x10] sm:$0xff]  ;;  %vm754_vm1 = vmmov 0  }
  0x14   : > { %600 = vmatprep.subr.mxu0 %v753_v8  ;;  %608 = vmatprep.mubr.msk.f32.mxu0 %vm754_vm1, %v753_v8  ;;  %v307_v10 = vld [vmem:[%s989_s3 + $0x8] sm:$0xff]  ;;  %v306_v11 = vld [vmem:[%s989_s3] sm:$0xff]  ;;  %v410_v12 = vld [vmem:[%s991_s5 + $0x78] sm:$0xff]  ;;  %s755_s28 = smov [#allocation2]  }
  0x15   : > { %s568_s14 = sshll.u32 %s271_s13, 3  ;;  %601 = vmatpush3.msra.mxu0 %v309_v7  ;;  %611 = vmatprep.subr.mxu1 %v753_v8  ;;  %v409_v13 = vld [vmem:[%s991_s5 + $0x70] sm:$0xff]  ;;  %v408_v14 = vld [vmem:[%s991_s5 + $0x68] sm:$0xff]  ;;  %v407_v15 = vld [vmem:[%s991_s5 + $0x60] sm:$0xff]  ;;  %s269_s13 = scalar_lea.vmem [#allocation2], %s567_s23 }
  0x16   : > { %s273_s17 = scalar_lea.vmem %s986_s0, %s568_s14  ;;  %602 = vmatprep.subr.mxu0 %v753_v8  ;;  %643 = vmatprep.mubr.msk.f32.mxu1 %vm754_vm1, %v753_v8  ;;  %v569_v20 = vld [vmem:[%s987_s1] ss:$0 sm:$0xff]  ;;  %v406_v25 = vld [vmem:[%s991_s5 + $0x58] sm:$0xff]  ;;  %v405_v26 = vld [vmem:[%s991_s5 + $0x50] sm:$0xff]  ;;  %s504_s14 = sshll.u32 %s269_s13, 4  ;;  %s505_s14 = int_to_ptr.vmem [resolvable:$true] %s504_s14 }
  0x17   : > { %v849_v0 = vld [vmem:[%s273_s17] sm:$0xff]  ;;  %603 = vmatpush3.msra.mxu0 %v308_v9  ;;  %612 = vmatpush3.msra.mxu1 %v410_v12  ;;  %v404_v27 = vld [vmem:[%s991_s5 + $0x48] sm:$0xff]  ;;  %v402_v29 = vld [vmem:[%s991_s5 + $0x38] sm:$0xff]  ;;  %s502_s17 = scalar_lea.hbm %s993_s7, %s575_s9  ;;  %s691_s19 = scalar_lea.vmem %s505_s14, 128 }
  0x18   : > { %v276_v1 = vsel %vm275_vm0, %v849_v0, 0.0  ;;  %604 = vmatprep.subr.mxu0 %v753_v8  ;;  %613 = vmatprep.subr.mxu1 %v753_v8  ;;  %v570_v22 = vld [vmem:[%s988_s2] ss:$0 sm:$0xff]  ;;  %v401_v30 = vld [vmem:[%s991_s5 + $0x30] sm:$0xff]  ;;  %v400_v31 = vld [vmem:[%s991_s5 + $0x28] sm:$0xff]  ;;  %p692_p11 = scmp.ne.s32.totalorder %s505_s14, %s691_s19  ;;  %s695_s20 = sshll.u32 %s755_s28, 4  ;;  %s696_s20 = int_to_ptr.vmem [resolvable:$false] %s695_s20 }
  0x19   : > { %277 = vadd.xlane.f32.xlu0 %v276_v1  ;;  %605 = vmatpush3.msra.mxu0 %v307_v10  ;;  %v403_v28 = vld [vmem:[%s991_s5 + $0x40] sm:$0xff]  ;;  %v398_v33 = vld [vmem:[%s991_s5 + $0x18] sm:$0xff]  ;;  %v397_v34 = vld [vmem:[%s991_s5 + $0x10] sm:$0xff]  ;;  %s697_s21 = scalar_lea.vmem %s696_s20, 256  ;;  %p698_p0 = scmp.lt.s32.totalorder %s505_s14, %s696_s20 }
  0x1a   : > { %606 = vmatprep.subr.mxu0 %v753_v8  ;;  %614 = vmatpush3.msra.mxu1 %v409_v13  ;;  %v399_v32 = vld [vmem:[%s991_s5 + $0x20] sm:$0xff]  ;;  %v396_v35 = vld [vmem:[%s991_s5 + $0x8] sm:$0xff]  ;;  %p693_p12 = pnand %p692_p11, %p834_p5  ;;  %p699_p1 = scmp.lt.s32.totalorder %s697_s21, %s691_s19 }
  0x1b   : > { %607 = vmatpush3.msra.mxu0 %v306_v11  ;;  %615 = vmatprep.subr.mxu1 %v753_v8  ;;  %v395_v36 = vld [vmem:[%s991_s5] sm:$0xff] }
  0x1c   : > { %616 = vmatpush3.msra.mxu1 %v408_v14  ;;  %v571_v37 = vld [vmem:[%s990_s4] ss:$0 sm:$0xff]  ;;  %p694_p13 = pneg %p693_p12  ;;  %p700_p2 = por %p699_p1, %p698_p0 }
  0x1d   : > { %617 = vmatprep.subr.mxu1 %v753_v8  ;;  %v573_v46 = vld [vmem:[%s992_s6] ss:$0 sm:$0xff] }
  0x1e   : > { %618 = vmatpush3.msra.mxu1 %v407_v15  ;;  %p701_p3 = pnand %p700_p2, %p694_p13 }
  0x1f   : > { %619 = vmatprep.subr.mxu1 %v753_v8 }
  0x20   : > { %620 = vmatpush3.msra.mxu1 %v406_v25 }
  0x21   : > { %621 = vmatprep.subr.mxu1 %v753_v8 }
  0x22   : > { %622 = vmatpush3.msra.mxu1 %v405_v26 }
  0x23   : > { %623 = vmatprep.subr.mxu1 %v753_v8 }
  0x24   : > { %624 = vmatpush3.msra.mxu1 %v404_v27 }
  0x25   : > { %625 = vmatprep.subr.mxu1 %v753_v8 }
  0x26   : > { %626 = vmatpush3.msra.mxu1 %v403_v28 }
  0x27   : > { %627 = vmatprep.subr.mxu1 %v753_v8 }
  0x28   : > { %628 = vmatpush3.msra.mxu1 %v402_v29 }
  0x29   : > { %629 = vmatprep.subr.mxu1 %v753_v8 }
  0x2a   : > { %630 = vmatpush3.msra.mxu1 %v401_v30 }
  0x2b   : > { %631 = vmatprep.subr.mxu1 %v753_v8 }
  0x2c   : > { %632 = vmatpush3.msra.mxu1 %v400_v31 }
  0x2d   : > { %633 = vmatprep.subr.mxu1 %v753_v8 }
  0x2e   : > { %634 = vmatpush3.msra.mxu1 %v399_v32 }
  0x2f   : > { %635 = vmatprep.subr.mxu1 %v753_v8 }
  0x30   : > { %636 = vmatpush3.msra.mxu1 %v398_v33 }
  0x31   : > { %637 = vmatprep.subr.mxu1 %v753_v8 }
  0x32   : > { %638 = vmatpush3.msra.mxu1 %v397_v34 }
  0x33   : > { %639 = vmatprep.subr.mxu1 %v753_v8 }
  0x34   : > { %640 = vmatpush3.msra.mxu1 %v396_v35 }
  0x35   : > { %641 = vmatprep.subr.mxu1 %v753_v8 }
  0x36   : > { %642 = vmatpush3.msra.mxu1 %v395_v36 }
  0xa2   : > { %v278_v2 = vpop.xlane.xlu0 %277 }
  0xa3   : > { %v280_v3 = vmul.f32 0.03125, %v278_v2 }
  0xa5   : > { %v281_v4 = vsub.f32 %v849_v0, %v280_v3 }
  0xa7   : > { %v282_v5 = vmul.f32 %v281_v4, %v281_v4 }
  0xa9   : > { %v283_v6 = vsel %vm275_vm0, %v282_v5, 0.0 }
  0xaa   : > { %284 = vadd.xlane.f32.xlu0 %v283_v6 }
 0x133   : > { %v285_v16 = vpop.xlane.xlu0 %284 }
 0x134   : > { %v286_v17 = vmul.f32 0.03125, %v285_v16 }
 0x136   : > { %v287_v18 = vadd.f32 1e-05, %v286_v17 }
 0x138   : > { %687 = vrsqrt.f32 %v287_v18 }
 0x145   : > { %v688_v19 = vpop.eup %687 }
 0x146   : > { %v289_v21 = vmul.f32 %v688_v19, %v281_v4 }
 0x148   : > { %v297_v23 = vmul.f32 %v569_v20, %v289_v21 }
 0x14a   : > { %v305_v24 = vadd.f32 %v570_v22, %v297_v23 }
 0x14c   : > { %609 = vmatmul.mubr.msk.f32.vlgmr.msra.gmra.mxu0 %vm275_vm0, %v305_v24 }
 0x20c   : > { %v386_v38 = vpop.f32.mrf.mxu0 }
 0x20d   : > { %v387_v39 = vadd.f32 %v571_v37, %v386_v38 }
 0x20e   : > { %v610_v40 = vpop.f32.mrf.mxu0 }
 0x20f   : > { %v391_v41 = vmul.f32 0.70710677, %v387_v39  ;;  %v390_v43 = vmul.f32 0.5, %v387_v39 }
 0x211   : > { %689 = verf.f32 %v391_v41 }
 0x21e   : > { %v690_v42 = vpop.eup %689 }
 0x21f   : > { %v393_v44 = vadd.f32 1.0, %v690_v42 }
 0x221   : > { %v394_v45 = vmul.f32 %v393_v44, %v390_v43 }
 0x223   : > { %644 = vmatmul.mubr.f32.vlgmr.msra.gmra.mxu1 %v394_v45 }
 0x2e3   : > { %v484_v47 = vpop.f32.mrf.mxu1 }
 0x2e4   : > { %v485_v48 = vadd.f32 %v573_v46, %v484_v47 }
 0x2e5   : > { %v645_v49 = vpop.f32.mrf.mxu1 }
 0x2e6   : > { %v488_v50 = vadd.f32 %v485_v48, %v849_v0 }
 0x2e8   : > { %489 = vst.msk [vmem:[%s269_s13] sm:$0xff] %vm275_vm0, %v488_v50 }
 0x2e9   : > { %704 = shalt.err (!%p701_p3)
}
 0x2ea   : > { %s705_s23 = scalar_lea.hbm %s502_s17, 128  ;;  %s709_s8 = scalar_lea.hbm %s993_s7, 256 }
 0x2eb   : > { %p706_p4 = scmp.ne.s32.totalorder %s502_s17, %s705_s23  ;;  %p710_p9 = scmp.lt.s32.totalorder %s502_s17, %s993_s7 }
 0x2ec   : > { %p711_p10 = scmp.lt.s32.totalorder %s709_s8, %s705_s23 }
 0x2ed   : > { %p707_p7 = pnand %p706_p4, %p834_p5 }
 0x2ee   : > { %p712_p11 = por %p711_p10, %p710_p9 }
 0x2ef   : > { %p708_p8 = pneg %p707_p7 }
 0x2f1   : > { %p713_p12 = pnand %p712_p11, %p708_p8 }
 0x2f3   : > { %716 = shalt.err (!%p713_p12)
}
 0x2f4   : > { %646 = dma.vmem_to_hbm [thread:$0]  (%p834_p5), %s505_s14, 128, %s502_s17, %s491_s18  }
 0x2f5 PF: > { %p652_p13 = scmp.ge.s32.totalorder %s751_s27, 2  ;;  %s516_s15 = sand.u32 1, %s739_s24  }
 0x2f6   : > { %s517_s16 = scalar_lea.sflag [#allocation3], %s516_s15 }
 0x2f7   : > { %p649_p0 = pnand %p652_p13, %p838_p6 }
 0x2f9   : > { %p650_p1 = pneg %p649_p0 }
 0x2fb   : > { %734 = dma.done.wait (%p650_p1), %s517_s16, 128  }
 0x2fc   : > { %736 = vsyncadd (%p650_p1), %s517_s16, 4294967168  ;;  %p17_p2 = scmp.ge.s32.totalorder %s821_s30, 4   ;;  %s996_s24 = smov %s743_s25 }
 0x2fd   : > { %s997_s25 = smov %s747_s26  ;;  %s998_s26 = smov %s832_s10 }
 0x2fe   : > { %s999_s27 = smov %s821_s30  ;;  %19 = sbr.rel (!%p17_p2) target bundleno = 3 (0x3), region = 83 }
 0x303   :  { %522 = vsyncpa [#allocation3], 1 }
 0x304   :  { %524 = vsyncpa [#allocation3 + $0x1], 1 }

</bundles_post_ra>
